<compile_context>
chip_gen: v7x
topology: tpu7x:2x2x1
jax: 0.10.0
libtpu: 0.0.40
codegen_flags: <defaults>
</compile_context>

<pallas_src>
import functools
import math

import numpy as np
import jax
import jax.numpy as jnp
from jax import lax
from jax.experimental import pallas as pl
from jax.experimental.pallas import tpu as pltpu


def _vmem_limit_bytes():
    """Generation-aware scoped-VMEM budget: ~96 MiB on 128-MiB parts
    (v5e/v6e), 48 MiB on v7x (64 MiB physical per TensorCore)."""
    try:
        cap = pltpu.get_tpu_info().vmem_capacity_bytes
    except Exception:
        cap = 64 * 1024 * 1024  # conservative (v7x-sized) fallback
    if cap >= 100 * 1024 * 1024:
        return 96 * 1024 * 1024
    return 48 * 1024 * 1024


def _pick_tile(full, desired, align):
    """Largest tile <= desired that is a multiple of `align` and divides
    `full`.  Falls back to the full dimension only if it is not absurdly
    larger than `desired` (a full-dim block is always a legal shape)."""
    if full <= desired:
        return full
    t = (desired // align) * align
    while t >= align:
        if full % t == 0:
            return t
        t -= align
    if full <= 4 * desired:
        return full
    # TODO(synk): support padded / masked tail tiles for awkward dims.
    raise ValueError(
        f"no aligned tile <= {desired} divides dimension {full}; pad the "
        f"input to a multiple of {align} or pass an explicit tile size")


# ---------------------------------------------------------------------------
# Fused QKV projection: one wide matmul per k step, Q/K/V split in epilogue.
# ---------------------------------------------------------------------------
def _qkv_proj_kernel(x_ref, w_ref, b_ref, q_ref, k_ref, v_ref, acc_ref,
                     *, hdt, q_scale):
    kidx = pl.program_id(1)

    @pl.when(kidx == 0)
    def _():
        acc_ref[...] = jnp.zeros_like(acc_ref)

    # single (tm, tk) x (tk, 3*hdt) matmul feeds Q, K and V
    acc_ref[...] += jnp.dot(x_ref[...], w_ref[...],
                            preferred_element_type=jnp.float32)

    @pl.when(kidx == pl.num_programs(1) - 1)
    def _():
        y = acc_ref[...] + b_ref[...]
        # fold 1/sqrt(head_dim) into Q so the L x L score path has no scaling
        q_ref[...] = (y[:, :hdt] * q_scale).astype(q_ref.dtype)
        k_ref[...] = y[:, hdt:2 * hdt].astype(k_ref.dtype)
        v_ref[...] = y[:, 2 * hdt:].astype(v_ref.dtype)


def qkv_projection(x2d, w_qkv, b_qkv, *, hdt, q_scale, out_dtype, vmem_limit,
                   tm_desired=512, tk_desired=512, sub_align=8):
    n, din = x2d.shape
    assert w_qkv.shape == (din, 3 * hdt)
    tm = _pick_tile(n, tm_desired, sub_align)
    tk = _pick_tile(din, tk_desired, 128)
    grid = (n // tm, din // tk)

    kern = functools.partial(_qkv_proj_kernel, hdt=hdt, q_scale=q_scale)
    out_sds = jax.ShapeDtypeStruct((n, hdt), out_dtype)
    return pl.pallas_call(
        kern,
        out_shape=(out_sds, out_sds, out_sds),
        grid=grid,
        in_specs=[
            pl.BlockSpec((tm, tk), lambda i, k: (i, k)),
            pl.BlockSpec((tk, 3 * hdt), lambda i, k: (k, 0)),
            pl.BlockSpec((1, 3 * hdt), lambda i, k: (0, 0)),
        ],
        out_specs=(
            pl.BlockSpec((tm, hdt), lambda i, k: (i, 0)),
            pl.BlockSpec((tm, hdt), lambda i, k: (i, 0)),
            pl.BlockSpec((tm, hdt), lambda i, k: (i, 0)),
        ),
        scratch_shapes=[pltpu.VMEM((tm, 3 * hdt), jnp.float32)],
        compiler_params=pltpu.CompilerParams(
            dimension_semantics=("parallel", "arbitrary"),
            vmem_limit_bytes=vmem_limit),
    )(x2d, w_qkv, b_qkv)


# ---------------------------------------------------------------------------
# Flash (online-softmax) attention with fused ff epilogue.
# Grid: (batch, q_tiles, kv_tiles[arbitrary]).  Per-batch valid kv-tile
# counts are scalar-prefetched so fully-padded kv tiles are skipped.
# ---------------------------------------------------------------------------
def _flash_ff_kernel(kvt_ref, q_ref, k_ref, v_ref, mask_ref, ffw_ref, ffb_ref,
                     o_ref, m_sc, l_sc, acc_sc, *, num_head, head_dim):
    b = pl.program_id(0)
    ki = pl.program_id(2)

    @pl.when(ki == 0)
    def _():
        m_sc[...] = jnp.full_like(m_sc, -jnp.inf)
        l_sc[...] = jnp.zeros_like(l_sc)
        acc_sc[...] = jnp.zeros_like(acc_sc)

    @pl.when(ki < kvt_ref[b])          # skip fully-padded kv tiles
    def _():
        # additive key-mask bias (f32): 0 valid, -1e6 padded; hoisted out of
        # the head loop.
        mbias = (mask_ref[0] - 1.0) * 1e6                 # (1, tk)

        for h in range(num_head):                         # static head unroll
            lo = h * head_dim
            hi = lo + head_dim
            q = q_ref[0, :, lo:hi]                        # (tq, D), pre-scaled
            k = k_ref[0, :, lo:hi]                        # (tk, D)
            v = v_ref[0, :, lo:hi]                        # (tk, D)

            # QK^T without materializing k.T: contract dim 1 of both operands.
            s = lax.dot_general(q, k, (((1,), (1,)), ((), ())),
                                preferred_element_type=jnp.float32) + mbias

            m_prev = m_sc[h]                              # (tq, 1) f32
            m_new = jnp.maximum(m_prev, jnp.max(s, axis=-1, keepdims=True))
            alpha = jnp.exp(m_prev - m_new)               # (tq, 1)
            p = jnp.exp(s - m_new)                        # (tq, tk) f32

            l_sc[h] = alpha * l_sc[h] + jnp.sum(p, axis=-1, keepdims=True)
            # bf16 MXU inputs, f32 accumulation (full rate on v5e/v6e/v7x)
            acc_sc[h] = alpha * acc_sc[h] + jnp.dot(
                p.astype(jnp.bfloat16), v.astype(jnp.bfloat16),
                preferred_element_type=jnp.float32)
            m_sc[h] = m_new

    @pl.when(ki == pl.num_programs(2) - 1)
    def _():
        # Normalize the (tq, D) accumulators and apply the ff projection as a
        # fused epilogue: out = sum_h (acc_h / l_h) @ ff_w[h*D:(h+1)*D] + ff_b.
        total = None
        for h in range(num_head):
            inv_l = pl.reciprocal(l_sc[h], approx=False)  # exact: feeds the ff matmul
            attn_h = acc_sc[h] * inv_l                    # (tq, D) f32
            w_h = ffw_ref[h * head_dim:(h + 1) * head_dim, :]
            contrib = jnp.dot(attn_h.astype(w_h.dtype), w_h,
                              preferred_element_type=jnp.float32)
            total = contrib if total is None else total + contrib
        o_ref[0] = (total + ffb_ref[...]).astype(o_ref.dtype)


def flash_attention_ff(Q, K, V, mask, ff_w, ff_b, *, num_head, head_dim,
                       vmem_limit, tq_desired=512, tk_desired=None):
    """Q, K, V: (B, L, num_head*head_dim) with Q pre-scaled by 1/sqrt(D);
    mask: (B, L) of {0,1}; ff_w: (hdt, dim); ff_b: (1, dim) f32.
    Returns ff(softmax-attention output), shape (B, L, dim), f32."""
    B, L, hdt = Q.shape
    assert hdt == num_head * head_dim
    dim = ff_w.shape[1]

    if tk_desired is None:
        tk_desired = 1024 if vmem_limit >= 96 * 1024 * 1024 else 512
    sub_align = 16 if Q.dtype == jnp.bfloat16 else 8
    tq = _pick_tile(L, tq_desired, sub_align)
    tk = _pick_tile(L, tk_desired, 128)
    n_q, n_kv = L // tq, L // tk
    grid = (B, n_q, n_kv)

    mask3 = mask.reshape(B, 1, L).astype(jnp.float32)

    # per-batch number of kv tiles covering up to the last valid key
    idx = jnp.arange(L, dtype=jnp.int32)[None, :]
    last_valid = jnp.max(jnp.where(mask > 0, idx, -1), axis=-1)      # (B,)
    kv_tiles = jnp.clip((last_valid + tk) // tk, 1, n_kv).astype(jnp.int32)

    kern = functools.partial(_flash_ff_kernel,
                             num_head=num_head, head_dim=head_dim)

    def _kv(ki, kvt, b):
        # clamp skipped steps onto the last valid tile -> no redundant DMA
        return jnp.minimum(ki, kvt[b] - 1)

    grid_spec = pltpu.PrefetchScalarGridSpec(
        num_scalar_prefetch=1,
        grid=grid,
        in_specs=[
            pl.BlockSpec((1, tq, hdt), lambda b, qi, ki, kvt: (b, qi, 0)),
            pl.BlockSpec((1, tk, hdt),
                         lambda b, qi, ki, kvt: (b, _kv(ki, kvt, b), 0)),
            pl.BlockSpec((1, tk, hdt),
                         lambda b, qi, ki, kvt: (b, _kv(ki, kvt, b), 0)),
            pl.BlockSpec((1, 1, tk),
                         lambda b, qi, ki, kvt: (b, 0, _kv(ki, kvt, b))),
            pl.BlockSpec((hdt, dim), lambda b, qi, ki, kvt: (0, 0)),   # resident
            pl.BlockSpec((1, dim), lambda b, qi, ki, kvt: (0, 0)),     # resident
        ],
        out_specs=pl.BlockSpec((1, tq, dim), lambda b, qi, ki, kvt: (b, qi, 0)),
        scratch_shapes=[
            pltpu.VMEM((num_head, tq, 1), jnp.float32),          # running max
            pltpu.VMEM((num_head, tq, 1), jnp.float32),          # running sum
            pltpu.VMEM((num_head, tq, head_dim), jnp.float32),   # accumulator
        ],
    )
    return pl.pallas_call(
        kern,
        out_shape=jax.ShapeDtypeStruct((B, L, dim), jnp.float32),
        grid_spec=grid_spec,
        compiler_params=pltpu.CompilerParams(
            dimension_semantics=("parallel", "parallel", "arbitrary"),
            vmem_limit_bytes=vmem_limit),
    )(kv_tiles, Q, K, V, mask3, ff_w, ff_b)


# ---------------------------------------------------------------------------
# Attention module (forward only)
# ---------------------------------------------------------------------------
def init_params(key, dim, num_head, head_dim):
    ks = jax.random.split(key, 8)
    hd = num_head * head_dim
    scale = 0.02
    return {
        "W_q_w": jax.random.normal(ks[0], (dim, hd), jnp.float32) * scale,
        "W_q_b": jax.random.normal(ks[1], (hd,), jnp.float32) * scale,
        "W_k_w": jax.random.normal(ks[2], (dim, hd), jnp.float32) * scale,
        "W_k_b": jax.random.normal(ks[3], (hd,), jnp.float32) * scale,
        "W_v_w": jax.random.normal(ks[4], (dim, hd), jnp.float32) * scale,
        "W_v_b": jax.random.normal(ks[5], (hd,), jnp.float32) * scale,
        "ff_w": jax.random.normal(ks[6], (hd, dim), jnp.float32) * scale,
        "ff_b": jax.random.normal(ks[7], (dim,), jnp.float32) * scale,
    }


def attention_forward(params, X, mask, num_head, head_dim,
                      compute_dtype=jnp.float32):
    B, L, dim = X.shape
    hdt = num_head * head_dim
    vmem_limit = _vmem_limit_bytes()
    sub_align = 16 if compute_dtype == jnp.bfloat16 else 8

    x2d = X.reshape(B * L, dim).astype(compute_dtype)
    # fused (din, 3*hdt) weight / (1, 3*hdt) bias (tiny one-time wrapper ops)
    w_qkv = jnp.concatenate(
        [params["W_q_w"], params["W_k_w"], params["W_v_w"]],
        axis=1).astype(compute_dtype)
    b_qkv = jnp.concatenate(
        [params["W_q_b"], params["W_k_b"], params["W_v_b"]]
    ).reshape(1, -1).astype(jnp.float32)

    q_scale = 1.0 / math.sqrt(head_dim)
    Q2, K2, V2 = qkv_projection(
        x2d, w_qkv, b_qkv, hdt=hdt, q_scale=q_scale,
        out_dtype=compute_dtype, vmem_limit=vmem_limit, sub_align=sub_align)

    # (B, L, H*D) lane-dense layout; heads are sliced inside the kernel, so no
    # split_heads / combine_heads transposes touch HBM.
    Q = Q2.reshape(B, L, hdt)
    K = K2.reshape(B, L, hdt)
    V = V2.reshape(B, L, hdt)

    out = flash_attention_ff(
        Q, K, V, mask,
        ff_w=params["ff_w"].astype(compute_dtype),
        ff_b=params["ff_b"].reshape(1, -1).astype(jnp.float32),
        num_head=num_head, head_dim=head_dim, vmem_limit=vmem_limit)
    return out  # (B, L, dim) f32


# pure-JAX reference for validation
def split_heads(x, num_head, head_dim):
    B, L, _ = x.shape
    return x.reshape(B, L, num_head, head_dim).transpose(0, 2, 1, 3)


def combine_heads(x):
    B, H, L, D = x.shape
    return x.transpose(0, 2, 1, 3).reshape(B, L, H * D)


def attention_forward_ref(params, X, mask, num_head, head_dim):
    Q = split_heads(X @ params["W_q_w"] + params["W_q_b"], num_head, head_dim)
    K = split_heads(X @ params["W_k_w"] + params["W_k_b"], num_head, head_dim)
    V = split_heads(X @ params["W_v_w"] + params["W_v_b"], num_head, head_dim)
    dot = jnp.einsum("bhld,bhmd->bhlm", Q, K) / math.sqrt(head_dim)
    dot = dot - 1e6 * (1.0 - mask[:, None, None, :])
    attn = jax.nn.softmax(dot, axis=-1)
    x = jnp.einsum("bhlm,bhmd->bhld", attn, V)
    x = combine_heads(x)
    return x @ params["ff_w"] + params["ff_b"]


if __name__ == "__main__":
    # small shapes: batch=2, seq=8, transformer_dim=32, num_head=2, head_dim=16
    B, L, DIM, H, HD = 2, 8, 32, 2, 16

    key = jax.random.PRNGKey(0)
    k_param, k_x, k_mask = jax.random.split(key, 3)

    params = init_params(k_param, DIM, H, HD)
    X = jax.random.normal(k_x, (B, L, DIM), jnp.float32)
    # mask: first few tokens valid, rest padded (like LRA padding masks)
    mask = (jnp.arange(L)[None, :] < jnp.array([L, L - 2])[:, None]).astype(jnp.float32)

    ref = attention_forward_ref(params, X, mask, H, HD)

    # f32 path (PV matmul runs in bf16 with f32 accumulation)
    out = attention_forward(params, X, mask, H, HD, compute_dtype=jnp.float32)
    out = jax.block_until_ready(out)
    np.testing.assert_allclose(np.asarray(out), np.asarray(ref),
                               rtol=2e-3, atol=1e-3)

    # bf16 MXU path (mask bias and softmax stats stay f32) — loose tolerance
    out_bf16 = attention_forward(params, X, mask, H, HD,
                                 compute_dtype=jnp.bfloat16)
    out_bf16 = jax.block_until_ready(out_bf16)
    np.testing.assert_allclose(np.asarray(out_bf16), np.asarray(ref),
                               rtol=5e-2, atol=5e-3)

    print("KERNEL_OK")
</pallas_src>

<mosaic_0001>
module attributes {stable_mosaic.version = 11 : i64} {
  func.func @_qkv_proj_kernel(%arg0: i32, %arg1: i32, %arg2: memref<16x32xf32, #tpu.memory_space<vmem>>, %arg3: memref<32x96xf32, #tpu.memory_space<vmem>>, %arg4: memref<1x96xf32, #tpu.memory_space<vmem>>, %arg5: memref<16x32xf32, #tpu.memory_space<vmem>>, %arg6: memref<16x32xf32, #tpu.memory_space<vmem>>, %arg7: memref<16x32xf32, #tpu.memory_space<vmem>>, %arg8: memref<16x96xf32, #tpu.memory_space<vmem>>) attributes {dimension_semantics = [#tpu.dimension_semantics<parallel>, #tpu.dimension_semantics<arbitrary>], iteration_bounds = array<i64: 1, 1>, scalar_prefetch = 0 : i64, scratch_operands = 1 : i64, tpu.core_type = #tpu.core_type<tc>, window_params = [{transform_indices = @transform_0, window_bounds = array<i64: 16, 32>}, {transform_indices = @transform_1, window_bounds = array<i64: 32, 96>}, {pipeline_mode = #tpu.pipeline_mode<synchronous>, transform_indices = @transform_2, window_bounds = array<i64: 1, 96>}, {transform_indices = @transform_3, window_bounds = array<i64: 16, 32>}, {transform_indices = @transform_4, window_bounds = array<i64: 16, 32>}, {transform_indices = @transform_5, window_bounds = array<i64: 16, 32>}]} {
    %c0_i32 = arith.constant 0 : i32
    %0 = arith.cmpi eq, %arg1, %c0_i32 : i32
    %1 = arith.extui %0 : i1 to i32
    %c0_i32_0 = arith.constant 0 : i32
    %2 = arith.cmpi ne, %1, %c0_i32_0 : i32
    scf.if %2 {
      %cst_10 = arith.constant 0.000000e+00 : f32
      %12 = vector.broadcast %cst_10 : f32 to vector<16x96xf32>
      %c0_11 = arith.constant 0 : index
      %c0_12 = arith.constant 0 : index
      %13 = vector.load %arg8[%c0_11, %c0_12] : memref<16x96xf32, #tpu.memory_space<vmem>>, vector<16x96xf32>
      tpu.vector_store %arg8[%c0_11, %c0_12], %12 {strides = array<i32>} : memref<16x96xf32, #tpu.memory_space<vmem>>, vector<16x96xf32>,
    } else {
    }
    %c0 = arith.constant 0 : index
    %c0_1 = arith.constant 0 : index
    %3 = vector.load %arg8[%c0, %c0_1] : memref<16x96xf32, #tpu.memory_space<vmem>>, vector<16x96xf32>
    %c0_2 = arith.constant 0 : index
    %c0_3 = arith.constant 0 : index
    %4 = vector.load %arg2[%c0_2, %c0_3] : memref<16x32xf32, #tpu.memory_space<vmem>>, vector<16x32xf32>
    %c0_4 = arith.constant 0 : index
    %c0_5 = arith.constant 0 : index
    %5 = vector.load %arg3[%c0_4, %c0_5] : memref<32x96xf32, #tpu.memory_space<vmem>>, vector<32x96xf32>
    %cst = arith.constant dense<0.000000e+00> : vector<16x96xf32>
    %6 = tpu.matmul %4, %5, %cst {dimension_numbers = #tpu.dot_dimension_numbers<[1], [0], [0], [1], [0, 0, 1, 1], [], []>} : vector<16x32xf32>, vector<32x96xf32>, vector<16x96xf32> -> vector<16x96xf32>
    %7 = arith.addf %3, %6 : vector<16x96xf32>
    %c0_6 = arith.constant 0 : index
    %c0_7 = arith.constant 0 : index
    %8 = vector.load %arg8[%c0_6, %c0_7] : memref<16x96xf32, #tpu.memory_space<vmem>>, vector<16x96xf32>
    tpu.vector_store %arg8[%c0_6, %c0_7], %7 {strides = array<i32>} : memref<16x96xf32, #tpu.memory_space<vmem>>, vector<16x96xf32>,
    %c0_i32_8 = arith.constant 0 : i32
    %9 = arith.cmpi eq, %arg1, %c0_i32_8 : i32
    %10 = arith.extui %9 : i1 to i32
    %c0_i32_9 = arith.constant 0 : i32
    %11 = arith.cmpi ne, %10, %c0_i32_9 : i32
    scf.if %11 {
      %c0_10 = arith.constant 0 : index
      %c0_11 = arith.constant 0 : index
      %12 = vector.load %arg8[%c0_10, %c0_11] : memref<16x96xf32, #tpu.memory_space<vmem>>, vector<16x96xf32>
      %c0_12 = arith.constant 0 : index
      %c0_13 = arith.constant 0 : index
      %13 = vector.load %arg4[%c0_12, %c0_13] : memref<1x96xf32, #tpu.memory_space<vmem>>, vector<1x96xf32>
      %14 = vector.broadcast %13 : vector<1x96xf32> to vector<16x96xf32>
      %15 = arith.addf %12, %14 : vector<16x96xf32>
      %16 = vector.extract_strided_slice %15 {offsets = [0, 0], sizes = [16, 32], strides = [1, 1]} : vector<16x96xf32> to vector<16x32xf32>
      %cst_14 = arith.constant 2.500000e-01 : f32
      %17 = vector.broadcast %cst_14 : f32 to vector<16x32xf32>
      %18 = arith.mulf %16, %17 : vector<16x32xf32>
      %c0_15 = arith.constant 0 : index
      %c0_16 = arith.constant 0 : index
      %19 = vector.load %arg5[%c0_15, %c0_16] : memref<16x32xf32, #tpu.memory_space<vmem>>, vector<16x32xf32>
      tpu.vector_store %arg5[%c0_15, %c0_16], %18 {strides = array<i32>} : memref<16x32xf32, #tpu.memory_space<vmem>>, vector<16x32xf32>,
      %20 = vector.extract_strided_slice %15 {offsets = [0, 32], sizes = [16, 32], strides = [1, 1]} : vector<16x96xf32> to vector<16x32xf32>
      %c0_17 = arith.constant 0 : index
      %c0_18 = arith.constant 0 : index
      %21 = vector.load %arg6[%c0_17, %c0_18] : memref<16x32xf32, #tpu.memory_space<vmem>>, vector<16x32xf32>
      tpu.vector_store %arg6[%c0_17, %c0_18], %20 {strides = array<i32>} : memref<16x32xf32, #tpu.memory_space<vmem>>, vector<16x32xf32>,
      %22 = vector.extract_strided_slice %15 {offsets = [0, 64], sizes = [16, 32], strides = [1, 1]} : vector<16x96xf32> to vector<16x32xf32>
      %c0_19 = arith.constant 0 : index
      %c0_20 = arith.constant 0 : index
      %23 = vector.load %arg7[%c0_19, %c0_20] : memref<16x32xf32, #tpu.memory_space<vmem>>, vector<16x32xf32>
      tpu.vector_store %arg7[%c0_19, %c0_20], %22 {strides = array<i32>} : memref<16x32xf32, #tpu.memory_space<vmem>>, vector<16x32xf32>,
    } else {
    }
    return
  }
  func.func @transform_0(%arg0: i32, %arg1: i32) -> (i32, i32) {
    %c0_i32 = arith.constant 0 : i32
    return %arg0, %arg1 : i32, i32
  }
  func.func @transform_1(%arg0: i32, %arg1: i32) -> (i32, i32) {
    %c0_i32 = arith.constant 0 : i32
    %c0_i32_0 = arith.constant 0 : i32
    return %arg1, %c0_i32 : i32, i32
  }
  func.func @transform_2(%arg0: i32, %arg1: i32) -> (i32, i32) {
    %c0_i32 = arith.constant 0 : i32
    %c0_i32_0 = arith.constant 0 : i32
    %c0_i32_1 = arith.constant 0 : i32
    return %c0_i32, %c0_i32_0 : i32, i32
  }
  func.func @transform_3(%arg0: i32, %arg1: i32) -> (i32, i32) {
    %c0_i32 = arith.constant 0 : i32
    %c0_i32_0 = arith.constant 0 : i32
    return %arg0, %c0_i32 : i32, i32
  }
  func.func @transform_4(%arg0: i32, %arg1: i32) -> (i32, i32) {
    %c0_i32 = arith.constant 0 : i32
    %c0_i32_0 = arith.constant 0 : i32
    return %arg0, %c0_i32 : i32, i32
  }
  func.func @transform_5(%arg0: i32, %arg1: i32) -> (i32, i32) {
    %c0_i32 = arith.constant 0 : i32
    %c0_i32_0 = arith.constant 0 : i32
    return %arg0, %c0_i32 : i32, i32
  }
}

</mosaic_0001>

<bundles_post_ra>
// kernel: tpu_custom_call.1
= control target key start
LH: loop header
LB: loop body
LE: loop exit
PB: predicated region body
PF: predicated region fallthrough
CT: control target
= control target key end

     0   :  { %11 = vsyncpa [#allocation4], 0  ;;  %s527_s0 = inlined_call_operand.hbm [shape: f32[16,32], index: 0, kind: input, shape index: {}]   ;;  %s528_s1 = inlined_call_operand.hbm [shape: f32[32,96], index: 1, kind: input, shape index: {}]   ;;  %s529_s2 = inlined_call_operand.vmem [shape: f32[1,96], index: 2, kind: input, shape index: {}]   ;;  %s530_s3 = inlined_call_operand.hbm [shape: f32[16,32], index: 3, kind: output, shape index: {0}]   ;;  %s531_s4 = inlined_call_operand.hbm [shape: f32[16,32], index: 4, kind: output, shape index: {1}]   ;;  %s532_s5 = inlined_call_operand.hbm [shape: f32[16,32], index: 5, kind: output, shape index: {2}]  }
   0x1   :  { %12 = vsyncpa [#allocation7], 0 }
   0x2   :  { %13 = vsyncpa [#allocation5], 0 }
   0x3   :  { %14 = vsyncpa [#allocation10], 0  ;;  %s390_s18 = smov [#allocation3]   ;;  %s272_s22 = scalar_lea.hbm %s527_s0, 256 }
   0x4   :  { %s20_s19 = sshll.u32 %s390_s18, 4  ;;  %p273_p0 = scmp.ne.s32.totalorder %s527_s0, %s272_s22  ;;  %s21_s19 = int_to_ptr.vmem [resolvable:$true] %s20_s19 }
   0x5   :  { %p276_p1 = scmp.lt.u32.totalorder %s272_s22, %s527_s0 }
   0x7   :  { %p278_p2 = pnand %p276_p1, %p273_p0 }
   0x9   :  { %281 = shalt.err (!%p278_p2)
}
   0xa   :  { %s282_s27 = scalar_lea.vmem %s21_s19, 256  ;;  %p287_p4 = scmp.lt.s32.totalorder %s21_s19, %s21_s19 }
   0xb   :  { %p283_p3 = scmp.ne.s32.totalorder %s21_s19, %s282_s27  ;;  %p288_p5 = scmp.lt.s32.totalorder %s282_s27, %s282_s27 }
   0xd   :  { %p289_p6 = por %p288_p5, %p287_p4 }
   0xf   :  { %p290_p7 = pnand %p289_p6, %p283_p3 }
  0x11   :  { %293 = shalt.err (!%p290_p7)
}
  0x12   :  { %s391_s28 = smov 128   ;;  %s392_s29 = smov 8  }
  0x13   :  { %26 = dma.hbm_to_vmem [thread:$0]  %s527_s0, 256, %s21_s19, [#allocation4], %s391_s28, %s391_s28, %s392_s29  }
  0x14   :  { %s393_s7 = smov [#allocation6]   ;;  %s294_s11 = scalar_lea.hbm %s528_s1, 512 }
  0x15   :  { %s32_s8 = sshll.u32 %s393_s7, 4  ;;  %p295_p8 = scmp.ne.s32.totalorder %s528_s1, %s294_s11  ;;  %s33_s8 = int_to_ptr.vmem [resolvable:$true] %s32_s8 }
  0x16   :  { %p298_p9 = scmp.lt.u32.totalorder %s294_s11, %s528_s1 }
  0x18   :  { %p300_p10 = pnand %p298_p9, %p295_p8 }
  0x1a   :  { %303 = shalt.err (!%p300_p10)
}
  0x1b   :  { %s304_s16 = scalar_lea.vmem %s33_s8, 512  ;;  %p309_p12 = scmp.lt.s32.totalorder %s33_s8, %s33_s8 }
  0x1c   :  { %p305_p11 = scmp.ne.s32.totalorder %s33_s8, %s304_s16  ;;  %p310_p13 = scmp.lt.s32.totalorder %s304_s16, %s304_s16 }
  0x1e   :  { %p311_p0 = por %p310_p13, %p309_p12 }
  0x20   :  { %p312_p1 = pnand %p311_p0, %p305_p11 }
  0x22   :  { %315 = shalt.err (!%p312_p1)
}
  0x23   :  { %38 = dma.hbm_to_vmem [thread:$0]  %s528_s1, 512, %s33_s8, [#allocation7], %s391_s28, %s391_s28, %s392_s29  }
  0x24   :  { %382 = dma.done.wait [#allocation4], 256  }
  0x25   :  { %383 = vsyncadd [#allocation4], 4294967040 }
  0x26   :  { %384 = dma.done.wait [#allocation7], 512  }
  0x27   :  { %385 = vsyncadd [#allocation7], 4294966784  ;;  %vm51_vm0 = vcmask 785408   ;;  %v394_v0 = vmov 0.0   ;;  %vm62_vm1 = vcmask 261120   ;;  %v58_v1 = vld [vmem:[#allocation6] sm:$0xff] }
  0x28   :  { %53 = vst.msk [vmem:[#allocation2 + $0x8] sm:$0xff] %vm51_vm0, %v394_v0  ;;  %52 = vst.msk [vmem:[#allocation2] sm:$0xff] %vm51_vm0, %v394_v0  ;;  %v59_v2 = vld [vmem:[#allocation6 + $0x8] sm:$0xff]  ;;  %v60_v3 = vld [vmem:[#allocation6 + $0x10] sm:$0xff]  ;;  %s395_s19 = smov [#allocation8]   ;;  %s396_s21 = smov 64  }
  0x29   :  { %v254_v4 = vpack.c.bf16 %v59_v2, %v58_v1  ;;  %v61_v5 = vld [vmem:[#allocation6 + $0x18] sm:$0xff]  ;;  %v56_v6 = vld [vmem:[#allocation3] sm:$0xff]  ;;  %v236_v15 = vld [vmem:[%s529_s2] ss:$0 sm:$0xff]  ;;  %s190_s20 = sshll.u32 %s395_s19, 4  ;;  %s397_s22 = smov 96   ;;  %s191_s20 = int_to_ptr.vmem [resolvable:$true] %s190_s20 }
  0x2a   :  { %v258_v7 = vpack.c.bf16 %v61_v5, %v60_v3  ;;  %251 = vmatprep.mubr.msk.f32.mxu0 %vm62_vm1, %v56_v6  ;;  %v57_v8 = vld [vmem:[#allocation3 + $0x8] sm:$0xff]  ;;  %s316_s23 = scalar_lea.vmem %s191_s20, 256  ;;  %p321_p3 = scmp.lt.s32.totalorder %s191_s20, %s191_s20 }
  0x2b   :  { %255 = vmatprep.subr.bf16.mxu0 %v254_v4  ;;  %p317_p2 = scmp.ne.s32.totalorder %s191_s20, %s316_s23  ;;  %p322_p4 = scmp.lt.s32.totalorder %s316_s23, %s316_s23 }
  0x2c   :  { %257 = vmatpush3.bf16.msra.mxu0 %v254_v4 }
  0x2d   :  { %259 = vmatprep.subr.bf16.mxu0 %v258_v7  ;;  %p323_p5 = por %p322_p4, %p321_p3 }
  0x2f   :  { %v55_v9 = vld [vmem:[#allocation2 + $0x8] sm:$0xff]  ;;  %v54_v10 = vld [vmem:[#allocation2] sm:$0xff]  ;;  %p324_p6 = pnand %p323_p5, %p317_p2 }
  0x30   :  { %261 = vmatpush3.bf16.msra.mxu0 %v258_v7 }
  0x33   :  { %252 = vmatmul.mubr.msk.f32.vlgmr.msra.gmra.mrb[0].mxu0 %vm62_vm1, %v57_v8 }
 0x106   :  { %v253_v11 = vpop.f32.mrb[0].mxu0 }
 0x107   :  { %v145_v12 = vadd.f32 %v253_v11, %v55_v9  ;;  %v135_v13 = vpop.f32.mrb[1].mxu0 }
 0x108   :  { %v144_v14 = vadd.f32 %v135_v13, %v54_v10 }
 0x109   :  { %148 = vst.msk [vmem:[#allocation2 + $0x8] sm:$0xff] %vm51_vm0, %v145_v12 }
 0x10a   :  { %147 = vst.msk [vmem:[#allocation2] sm:$0xff] %vm51_vm0, %v144_v14 }
 0x110   :  { %v153_v16 = vld [vmem:[#allocation2 + $0x8] sm:$0xff] }
 0x111   :  { %v152_v17 = vld [vmem:[#allocation2] sm:$0xff]  ;;  %v162_v18 = vadd.f32 %v236_v15, %v153_v16 }
 0x112   :  { %v161_v19 = vadd.f32 %v236_v15, %v152_v17 }
 0x113   :  { %v164_v20 = vmul.f32 0.25, %v162_v18 }
 0x114   :  { %177 = vrot.lane.b32.xlu1 %v161_v19, %s396_s21  ;;  %169 = vrot.lane.b32.xlu0 %v161_v19, %s397_s22  ;;  %v163_v21 = vmul.f32 0.25, %v161_v19 }
 0x115   :  { %166 = vst.msk [vmem:[#allocation8 + $0x8] sm:$0xff] %vm62_vm1, %v164_v20 }
 0x116   :  { %165 = vst.msk [vmem:[#allocation8] sm:$0xff] %vm62_vm1, %v163_v21 }
 0x117   :  { %327 = shalt.err (!%p324_p6)
}
 0x118   :  { %s328_s25 = scalar_lea.hbm %s530_s3, 256 }
 0x119   :  { %p329_p7 = scmp.ne.s32.totalorder %s530_s3, %s328_s25  ;;  %p332_p8 = scmp.lt.u32.totalorder %s328_s25, %s530_s3 }
 0x11b   :  { %p334_p9 = pnand %p332_p8, %p329_p7 }
 0x11d   :  { %337 = shalt.err (!%p334_p9)
}
 0x11e   :  { %196 = dma.vmem_to_hbm [thread:$0]  %s191_s20, 256, %s530_s3, [#allocation5], %s391_s28, %s391_s28, %s392_s29  }
 0x11f   :  { %179 = vrot.lane.b32.xlu1 %v162_v18, %s396_s21  ;;  %171 = vrot.lane.b32.xlu0 %v162_v18, %s397_s22  ;;  %s398_s9 = smov [#allocation9]   ;;  %s399_s11 = smov [#allocation11]  }
 0x120   :  { %s202_s10 = sshll.u32 %s398_s9, 4  ;;  %s214_s12 = sshll.u32 %s399_s11, 4  ;;  %s203_s10 = int_to_ptr.vmem [resolvable:$true] %s202_s10  ;;  %s488_s12 = int_to_ptr.vmem [resolvable:$true] %s214_s12 }
 0x121   :  { %s338_s3 = scalar_lea.vmem %s203_s10, 256  ;;  %p343_p11 = scmp.lt.s32.totalorder %s203_s10, %s203_s10 }
 0x122   :  { %p339_p10 = scmp.ne.s32.totalorder %s203_s10, %s338_s3  ;;  %p344_p12 = scmp.lt.s32.totalorder %s338_s3, %s338_s3 }
 0x124   :  { %p345_p13 = por %p344_p12, %p343_p11 }
 0x126   :  { %p346_p0 = pnand %p345_p13, %p339_p10 }
 0x186   :  { %v178_v22 = vpop.permute.xlu1 %177  ;;  %v170_v23 = vpop.permute.xlu0 %169 }
 0x187   :  { %183 = vst.msk [vmem:[#allocation11] sm:$0xff] %vm62_vm1, %v178_v22  ;;  %175 = vst.msk [vmem:[#allocation9] sm:$0xff] %vm62_vm1, %v170_v23 }
 0x191   :  { %v180_v24 = vpop.permute.xlu1 %179  ;;  %v172_v25 = vpop.permute.xlu0 %171 }
 0x192   :  { %184 = vst.msk [vmem:[#allocation11 + $0x8] sm:$0xff] %vm62_vm1, %v180_v24  ;;  %176 = vst.msk [vmem:[#allocation9 + $0x8] sm:$0xff] %vm62_vm1, %v172_v25 }
 0x193   :  { %349 = shalt.err (!%p346_p0)
}
 0x194   :  { %s350_s15 = scalar_lea.hbm %s531_s4, 256 }
 0x195   :  { %p351_p1 = scmp.ne.s32.totalorder %s531_s4, %s350_s15  ;;  %p354_p2 = scmp.lt.u32.totalorder %s350_s15, %s531_s4 }
 0x197   :  { %p356_p3 = pnand %p354_p2, %p351_p1 }
 0x199   :  { %359 = shalt.err (!%p356_p3)
}
 0x19a   :  { %208 = dma.vmem_to_hbm [thread:$0]  %s203_s10, 256, %s531_s4, [#allocation10], %s391_s28, %s391_s28, %s392_s29  }
 0x19b   :  { %s360_s20 = scalar_lea.vmem %s488_s12, 256  ;;  %p365_p5 = scmp.lt.s32.totalorder %s488_s12, %s488_s12 }
 0x19c   :  { %p361_p4 = scmp.ne.s32.totalorder %s488_s12, %s360_s20  ;;  %p366_p6 = scmp.lt.s32.totalorder %s360_s20, %s360_s20 }
 0x19e   :  { %p367_p7 = por %p366_p6, %p365_p5 }
 0x1a0   :  { %p368_p8 = pnand %p367_p7, %p361_p4 }
 0x1a2   :  { %371 = shalt.err (!%p368_p8)
}
 0x1a3   :  { %s372_s23 = scalar_lea.hbm %s532_s5, 256 }
 0x1a4   :  { %p373_p9 = scmp.ne.s32.totalorder %s532_s5, %s372_s23  ;;  %p376_p10 = scmp.lt.u32.totalorder %s372_s23, %s532_s5 }
 0x1a6   :  { %p378_p11 = pnand %p376_p10, %p373_p9 }
 0x1a8   :  { %381 = shalt.err (!%p378_p11)
}
 0x1a9   :  { %220 = dma.vmem_to_hbm [thread:$0]  %s488_s12, 256, %s532_s5, [#allocation10], %s391_s28, %s391_s28, %s392_s29  }
 0x1aa   :  { %386 = dma.done.wait [#allocation5], 256  }
 0x1ab   :  { %387 = vsyncadd [#allocation5], 4294967040 }
 0x1ac   :  { %388 = dma.done.wait [#allocation10], 512  }
 0x1ad   :  { %389 = vsyncadd [#allocation10], 4294966784 }
 0x1ae   :  { %230 = vsyncpa [#allocation4], 1 }
 0x1af   :  { %231 = vsyncpa [#allocation7], 1 }
 0x1b0   :  { %232 = vsyncpa [#allocation5], 1 }
 0x1b1   :  { %233 = vsyncpa [#allocation10], 1 }

</bundles_post_ra>
